<compile_context>
chip_gen: v7x
topology: tpu7x:2x2x1
jax: 0.10.0
libtpu: 0.0.40
codegen_flags: <defaults>
</compile_context>

<pallas_src>
import functools

import jax
import jax.numpy as jnp
from jax.experimental import pallas as pl
from jax.experimental.pallas import tpu as pltpu


def attention_kernel(x_ref, gamma_ref, beta_ref,
                     wq_ref, wk_ref, wv_ref, wout_ref, bout_ref,
                     o_ref, *, heads, dim_head, tq):
    """One (batch, query-tile) grid step: LayerNorm -> QKV -> MHA -> out-proj."""
    n = x_ref.shape[1]
    inner = heads * dim_head

    # LayerNorm (biased variance, eps=1e-5, matching torch) in f32 over the
    # full sequence; immediately cast to bf16 for the MXU projections.
    x = x_ref[0].astype(jnp.float32)                       # (N, D)
    gamma = gamma_ref[0]                                   # (D,) f32
    beta = beta_ref[0]                                     # (D,) f32
    mean = jnp.mean(x, axis=-1, keepdims=True)
    xc = x - mean
    var = jnp.mean(xc * xc, axis=-1, keepdims=True)
    xn_b = (xc * jax.lax.rsqrt(var + 1e-5) * gamma + beta).astype(jnp.bfloat16)

    if tq == n:
        xq_b = xn_b                                        # single query tile
    else:
        q_start = pl.multiple_of(pl.program_id(1) * tq, tq)
        xq_b = jax.lax.dynamic_slice_in_dim(xn_b, q_start, tq, axis=0)

    def to_heads(t, rows):                                 # (rows, inner) -> (h, rows, dh)
        return jnp.transpose(t.reshape(rows, heads, dim_head), (1, 0, 2))

    # Projections: one wide MXU matmul each (f32 accumulation, bf16 weights).
    # Softmax scale is already folded into W_q in the wrapper.  The f32
    # accumulator is cast to bf16 immediately so only one copy stays live.
    q = to_heads(jnp.dot(xq_b, wq_ref[...],
                         preferred_element_type=jnp.float32).astype(jnp.bfloat16), tq)
    k = to_heads(jnp.dot(xn_b, wk_ref[...],
                         preferred_element_type=jnp.float32).astype(jnp.bfloat16), n)
    v = to_heads(jnp.dot(xn_b, wv_ref[...],
                         preferred_element_type=jnp.float32).astype(jnp.bfloat16), n)

    # Head-batched attention scores (single batched MXU contraction), f32.
    s = jnp.einsum('hqd,hkd->hqk', q, k,
                   preferred_element_type=jnp.float32)     # (heads, TQ, N)

    # Softmax: f32 statistics, EUP reciprocal instead of a VALU divide, then a
    # single bf16 cast of the probabilities.  (approx reciprocal => rows sum to
    # 1 only to ~1e-3; fine for inference.)
    s = s - jnp.max(s, axis=-1, keepdims=True)
    s = jnp.exp(s)
    p = (s * pl.reciprocal(jnp.sum(s, axis=-1, keepdims=True), approx=True)
         ).astype(jnp.bfloat16)

    # Head-batched PV product, merge heads back to 'n (h d)'.
    o_h = jnp.einsum('hqk,hkd->hqd', p, v,
                     preferred_element_type=jnp.float32)   # (heads, TQ, dh)
    o2 = jnp.transpose(o_h.astype(jnp.bfloat16), (1, 0, 2)).reshape(tq, inner)

    # Output projection; bias added on the f32 accumulator before the cast.
    y = jnp.dot(o2, wout_ref[...], preferred_element_type=jnp.float32) + bout_ref[0]
    o_ref[0] = y.astype(o_ref.dtype)


def _vmem_budget_bytes():
    """~80% of this chip's per-core VMEM (headroom for compiler scratch)."""
    try:
        return int(0.8 * pltpu.get_tpu_info().vmem_capacity_bytes)
    except Exception:
        return 48 * 1024 * 1024   # conservative fallback, safe on all generations


def _resident_bytes(n, tq, d, heads, dim_head):
    """Generous estimate of the VMEM resident set for one grid step."""
    inner = heads * dim_head
    bf16, f32 = 2, 4
    io = 2 * f32 * (n * d + tq * d)                                  # x in, y out (dbl-buffered)
    io += 2 * (bf16 * (3 * d * inner + inner * d) + f32 * 3 * d)     # weights + ln/bias blocks
    scratch = (f32 * n * d + bf16 * n * d                            # LN f32 + bf16 copy
               + bf16 * (tq + 2 * n) * inner                         # q, k, v
               + 2 * f32 * heads * tq * n                            # scores (x2 headroom)
               + bf16 * heads * tq * n                               # probabilities
               + f32 * tq * inner + bf16 * tq * inner                # attention output
               + f32 * tq * d)                                       # projected output
    return io + scratch


def _choose_query_tile(n, d, heads, dim_head, budget):
    """Prefer TQ = N; only tile the query axis when the resident set won't fit."""
    candidates = [n] + [t for t in (2048, 1024, 512, 256, 128, 64, 32, 16, 8)
                        if t < n and n % t == 0]
    for tq in candidates:
        if _resident_bytes(n, tq, d, heads, dim_head) <= budget:
            return tq
    # TODO(synk): flash-style KV chunking (inner "arbitrary" KV grid axis with
    # online-softmax scratch) for sequences whose score tile never fits VMEM.
    return candidates[-1]


def pallas_attention(x, gamma, beta, w_qkv, w_out, b_out, *, heads, dim_head):
    B, N, D = x.shape
    inner = heads * dim_head
    scale = dim_head ** -0.5
    assert w_qkv.shape == (D, 3 * inner)

    # Split QKV and cast weights to bf16 in the wrapper (free in XLA); fold the
    # softmax scale into W_q.  (Folding before the bf16 cast changes rounding
    # slightly vs. applying scale post-dot; within tolerance.)
    w_q = (w_qkv[:, :inner] * scale).astype(jnp.bfloat16)
    w_k = w_qkv[:, inner:2 * inner].astype(jnp.bfloat16)
    w_v = w_qkv[:, 2 * inner:].astype(jnp.bfloat16)
    w_o = w_out.astype(jnp.bfloat16)

    budget = _vmem_budget_bytes()
    TQ = _choose_query_tile(N, D, heads, dim_head, budget)
    n_q_tiles = N // TQ

    kern = functools.partial(attention_kernel,
                             heads=heads, dim_head=dim_head, tq=TQ)

    # Grid: batch outermost ("parallel", feeds megacore), query tiles innermost
    # ("arbitrary") so the qi-invariant x / weight blocks are not re-fetched
    # and the full-sequence LN + K/V work is not duplicated across cores.
    # TODO(synk): mark the grid-invariant weight/bias BlockSpecs with
    # pipeline_mode=pl.Buffered(1) to drop their second pipeline buffer.
    return pl.pallas_call(
        kern,
        out_shape=jax.ShapeDtypeStruct((B, N, D), x.dtype),
        grid=(B, n_q_tiles),
        in_specs=[
            pl.BlockSpec((1, N, D), lambda b, qi: (b, 0, 0)),     # x (full sequence)
            pl.BlockSpec((1, D), lambda b, qi: (0, 0)),           # LN gamma (f32)
            pl.BlockSpec((1, D), lambda b, qi: (0, 0)),           # LN beta  (f32)
            pl.BlockSpec((D, inner), lambda b, qi: (0, 0)),       # W_q (bf16, *scale)
            pl.BlockSpec((D, inner), lambda b, qi: (0, 0)),       # W_k (bf16)
            pl.BlockSpec((D, inner), lambda b, qi: (0, 0)),       # W_v (bf16)
            pl.BlockSpec((inner, D), lambda b, qi: (0, 0)),       # W_out (bf16)
            pl.BlockSpec((1, D), lambda b, qi: (0, 0)),           # b_out (f32)
        ],
        out_specs=pl.BlockSpec((1, TQ, D), lambda b, qi: (b, qi, 0)),
        compiler_params=pltpu.CompilerParams(
            dimension_semantics=("parallel", "arbitrary"),
            vmem_limit_bytes=budget),
    )(x, gamma, beta, w_q, w_k, w_v, w_o, b_out)


def reference_attention(x, gamma, beta, w_qkv, w_out, b_out, *, heads, dim_head):
    """Pure-JAX (f32) reference mirroring the PyTorch forward."""
    B, N, D = x.shape
    inner = heads * dim_head
    scale = dim_head ** -0.5

    mean = jnp.mean(x, axis=-1, keepdims=True)
    var = jnp.mean((x - mean) ** 2, axis=-1, keepdims=True)
    xn = (x - mean) / jnp.sqrt(var + 1e-5) * gamma[0] + beta[0]

    qkv = xn @ w_qkv                                  # (B, N, 3*inner)
    q, k, v = jnp.split(qkv, 3, axis=-1)

    def split_heads(t):                               # 'b n (h d) -> b h n d'
        return t.reshape(B, N, heads, dim_head).transpose(0, 2, 1, 3)

    q, k, v = map(split_heads, (q, k, v))
    dots = jnp.einsum('bhid,bhjd->bhij', q, k) * scale
    attn = jax.nn.softmax(dots, axis=-1)
    out = jnp.einsum('bhij,bhjd->bhid', attn, v)
    out = out.transpose(0, 2, 1, 3).reshape(B, N, inner)
    return out @ w_out + b_out[0]


if __name__ == "__main__":
    B, N, D = 2, 8, 32
    heads, dim_head = 4, 16
    inner = heads * dim_head

    key = jax.random.PRNGKey(0)
    kx, kqkv, kwo, kbo = jax.random.split(key, 4)

    x = jax.random.normal(kx, (B, N, D), dtype=jnp.float32)
    gamma = jnp.ones((1, D), dtype=jnp.float32)       # LayerNorm weight init
    beta = jnp.zeros((1, D), dtype=jnp.float32)       # LayerNorm bias init
    w_qkv = jax.random.normal(kqkv, (D, 3 * inner), dtype=jnp.float32) * 0.05
    w_out = jax.random.normal(kwo, (inner, D), dtype=jnp.float32) * 0.05
    b_out = jax.random.normal(kbo, (1, D), dtype=jnp.float32) * 0.05

    y = pallas_attention(x, gamma, beta, w_qkv, w_out, b_out,
                         heads=heads, dim_head=dim_head)
    y = jax.block_until_ready(y)

    y_ref = reference_attention(x, gamma, beta, w_qkv, w_out, b_out,
                                heads=heads, dim_head=dim_head)
    # bf16 matmul operands (f32 accumulation) + approx reciprocal -> ~1e-3 abs
    # error at these magnitudes; 2e-2 tolerance is comfortably safe.
    assert jnp.allclose(y, y_ref, atol=2e-2, rtol=2e-2), "mismatch vs reference"

    print("KERNEL_OK")
</pallas_src>

<mosaic_0001>
module attributes {stable_mosaic.version = 11 : i64} {
  func.func @attention_kernel(%arg0: i32, %arg1: i32, %arg2: memref<1x8x32xf32, #tpu.memory_space<vmem>>, %arg3: memref<1x32xf32, #tpu.memory_space<vmem>>, %arg4: memref<1x32xf32, #tpu.memory_space<vmem>>, %arg5: memref<32x64xbf16, #tpu.memory_space<vmem>>, %arg6: memref<32x64xbf16, #tpu.memory_space<vmem>>, %arg7: memref<32x64xbf16, #tpu.memory_space<vmem>>, %arg8: memref<64x32xbf16, #tpu.memory_space<vmem>>, %arg9: memref<1x32xf32, #tpu.memory_space<vmem>>, %arg10: memref<1x8x32xf32, #tpu.memory_space<vmem>>) attributes {dimension_semantics = [#tpu.dimension_semantics<parallel>, #tpu.dimension_semantics<arbitrary>], iteration_bounds = array<i64: 2, 1>, scalar_prefetch = 0 : i64, scratch_operands = 0 : i64, tpu.core_type = #tpu.core_type<tc>, window_params = [{transform_indices = @transform_0, window_bounds = array<i64: 1, 8, 32>}, {pipeline_mode = #tpu.pipeline_mode<synchronous>, transform_indices = @transform_1, window_bounds = array<i64: 1, 32>}, {pipeline_mode = #tpu.pipeline_mode<synchronous>, transform_indices = @transform_2, window_bounds = array<i64: 1, 32>}, {pipeline_mode = #tpu.pipeline_mode<synchronous>, transform_indices = @transform_3, window_bounds = array<i64: 32, 64>}, {pipeline_mode = #tpu.pipeline_mode<synchronous>, transform_indices = @transform_4, window_bounds = array<i64: 32, 64>}, {pipeline_mode = #tpu.pipeline_mode<synchronous>, transform_indices = @transform_5, window_bounds = array<i64: 32, 64>}, {pipeline_mode = #tpu.pipeline_mode<synchronous>, transform_indices = @transform_6, window_bounds = array<i64: 64, 32>}, {pipeline_mode = #tpu.pipeline_mode<synchronous>, transform_indices = @transform_7, window_bounds = array<i64: 1, 32>}, {transform_indices = @transform_8, window_bounds = array<i64: 1, 8, 32>}]} {
    %c0 = arith.constant 0 : index
    %c0_0 = arith.constant 0 : index
    %c0_1 = arith.constant 0 : index
    %0 = vector.load %arg2[%c0, %c0_0, %c0_1] : memref<1x8x32xf32, #tpu.memory_space<vmem>>, vector<1x8x32xf32>
    %1 = vector.shape_cast %0 : vector<1x8x32xf32> to vector<8x32xf32>
    %c0_2 = arith.constant 0 : index
    %c0_3 = arith.constant 0 : index
    %2 = vector.load %arg3[%c0_2, %c0_3] : memref<1x32xf32, #tpu.memory_space<vmem>>, vector<1x32xf32>
    %3 = vector.shape_cast %2 : vector<1x32xf32> to vector<32xf32>
    %c0_4 = arith.constant 0 : index
    %c0_5 = arith.constant 0 : index
    %4 = vector.load %arg4[%c0_4, %c0_5] : memref<1x32xf32, #tpu.memory_space<vmem>>, vector<1x32xf32>
    %5 = vector.shape_cast %4 : vector<1x32xf32> to vector<32xf32>
    %cst = arith.constant dense<0.000000e+00> : vector<8xf32>
    %6 = vector.multi_reduction <add>, %1, %cst [1] : vector<8x32xf32> to vector<8xf32>
    %7 = vector.shape_cast %6 : vector<8xf32> to vector<8x1xf32>
    %cst_6 = arith.constant 3.200000e+01 : f32
    %8 = vector.broadcast %cst_6 : f32 to vector<8x1xf32>
    %9 = arith.divf %7, %8 : vector<8x1xf32>
    %10 = vector.broadcast %9 : vector<8x1xf32> to vector<8x32xf32>
    %11 = arith.subf %1, %10 : vector<8x32xf32>
    %12 = arith.mulf %11, %11 : vector<8x32xf32>
    %cst_7 = arith.constant dense<0.000000e+00> : vector<8xf32>
    %13 = vector.multi_reduction <add>, %12, %cst_7 [1] : vector<8x32xf32> to vector<8xf32>
    %14 = vector.shape_cast %13 : vector<8xf32> to vector<8x1xf32>
    %cst_8 = arith.constant 3.200000e+01 : f32
    %15 = vector.broadcast %cst_8 : f32 to vector<8x1xf32>
    %16 = arith.divf %14, %15 : vector<8x1xf32>
    %cst_9 = arith.constant 9.99999974E-6 : f32
    %17 = vector.broadcast %cst_9 : f32 to vector<8x1xf32>
    %18 = arith.addf %16, %17 : vector<8x1xf32>
    %19 = math.rsqrt %18 : vector<8x1xf32>
    %20 = vector.broadcast %19 : vector<8x1xf32> to vector<8x32xf32>
    %21 = arith.mulf %11, %20 : vector<8x32xf32>
    %22 = vector.shape_cast %3 : vector<32xf32> to vector<1x32xf32>
    %23 = vector.broadcast %22 : vector<1x32xf32> to vector<8x32xf32>
    %24 = arith.mulf %21, %23 : vector<8x32xf32>
    %25 = vector.shape_cast %5 : vector<32xf32> to vector<1x32xf32>
    %26 = vector.broadcast %25 : vector<1x32xf32> to vector<8x32xf32>
    %27 = arith.addf %24, %26 : vector<8x32xf32>
    %28 = arith.truncf %27 : vector<8x32xf32> to vector<8x32xbf16>
    %c0_10 = arith.constant 0 : index
    %c0_11 = arith.constant 0 : index
    %29 = vector.load %arg5[%c0_10, %c0_11] : memref<32x64xbf16, #tpu.memory_space<vmem>>, vector<32x64xbf16>
    %cst_12 = arith.constant dense<0.000000e+00> : vector<8x64xf32>
    %30 = tpu.matmul %28, %29, %cst_12 {dimension_numbers = #tpu.dot_dimension_numbers<[1], [0], [0], [1], [0, 0, 1, 1], [], []>} : vector<8x32xbf16>, vector<32x64xbf16>, vector<8x64xf32> -> vector<8x64xf32>
    %31 = arith.truncf %30 : vector<8x64xf32> to vector<8x64xbf16>
    %32 = vector.shape_cast %31 : vector<8x64xbf16> to vector<8x4x16xbf16>
    %33 = tpu.transpose %32, [1, 0, 2] : vector<8x4x16xbf16> -> vector<4x8x16xbf16>
    %c0_13 = arith.constant 0 : index
    %c0_14 = arith.constant 0 : index
    %34 = vector.load %arg6[%c0_13, %c0_14] : memref<32x64xbf16, #tpu.memory_space<vmem>>, vector<32x64xbf16>
    %cst_15 = arith.constant dense<0.000000e+00> : vector<8x64xf32>
    %35 = tpu.matmul %28, %34, %cst_15 {dimension_numbers = #tpu.dot_dimension_numbers<[1], [0], [0], [1], [0, 0, 1, 1], [], []>} : vector<8x32xbf16>, vector<32x64xbf16>, vector<8x64xf32> -> vector<8x64xf32>
    %36 = arith.truncf %35 : vector<8x64xf32> to vector<8x64xbf16>
    %37 = vector.shape_cast %36 : vector<8x64xbf16> to vector<8x4x16xbf16>
    %38 = tpu.transpose %37, [1, 0, 2] : vector<8x4x16xbf16> -> vector<4x8x16xbf16>
    %c0_16 = arith.constant 0 : index
    %c0_17 = arith.constant 0 : index
    %39 = vector.load %arg7[%c0_16, %c0_17] : memref<32x64xbf16, #tpu.memory_space<vmem>>, vector<32x64xbf16>
    %cst_18 = arith.constant dense<0.000000e+00> : vector<8x64xf32>
    %40 = tpu.matmul %28, %39, %cst_18 {dimension_numbers = #tpu.dot_dimension_numbers<[1], [0], [0], [1], [0, 0, 1, 1], [], []>} : vector<8x32xbf16>, vector<32x64xbf16>, vector<8x64xf32> -> vector<8x64xf32>
    %41 = arith.truncf %40 : vector<8x64xf32> to vector<8x64xbf16>
    %42 = vector.shape_cast %41 : vector<8x64xbf16> to vector<8x4x16xbf16>
    %43 = tpu.transpose %42, [1, 0, 2] : vector<8x4x16xbf16> -> vector<4x8x16xbf16>
    "tpu.trace_start"() <{level = 10 : i32, message = "hqd,hkd->hqk"}> : () -> ()
    %cst_19 = arith.constant dense<0.000000e+00> : vector<4x8x8xf32>
    %44 = tpu.matmul %33, %38, %cst_19 {dimension_numbers = #tpu.dot_dimension_numbers<[2], [2], [1], [1], [0, 0, 0, 1, 1, 1], [0], [0]>} : vector<4x8x16xbf16>, vector<4x8x16xbf16>, vector<4x8x8xf32> -> vector<4x8x8xf32>
    "tpu.trace_stop"() : () -> ()
    %cst_20 = arith.constant dense<0xFF800000> : vector<4x8xf32>
    %45 = vector.multi_reduction <maximumf>, %44, %cst_20 [2] : vector<4x8x8xf32> to vector<4x8xf32>
    %46 = vector.shape_cast %45 : vector<4x8xf32> to vector<4x8x1xf32>
    %47 = vector.broadcast %46 : vector<4x8x1xf32> to vector<4x8x8xf32>
    %48 = arith.subf %44, %47 : vector<4x8x8xf32>
    %49 = math.exp %48 : vector<4x8x8xf32>
    %cst_21 = arith.constant dense<0.000000e+00> : vector<4x8xf32>
    %50 = vector.multi_reduction <add>, %49, %cst_21 [2] : vector<4x8x8xf32> to vector<4x8xf32>
    %51 = vector.shape_cast %50 : vector<4x8xf32> to vector<4x8x1xf32>
    %52 = tpu.reciprocal %51 {approx = true} : vector<4x8x1xf32> -> vector<4x8x1xf32>
    %53 = vector.broadcast %52 : vector<4x8x1xf32> to vector<4x8x8xf32>
    %54 = arith.mulf %49, %53 : vector<4x8x8xf32>
    %55 = arith.truncf %54 : vector<4x8x8xf32> to vector<4x8x8xbf16>
    "tpu.trace_start"() <{level = 10 : i32, message = "hqk,hkd->hqd"}> : () -> ()
    %cst_22 = arith.constant dense<0.000000e+00> : vector<4x8x16xf32>
    %56 = tpu.matmul %55, %43, %cst_22 {dimension_numbers = #tpu.dot_dimension_numbers<[2], [1], [1], [2], [0, 0, 0, 1, 1, 2], [0], [0]>} : vector<4x8x8xbf16>, vector<4x8x16xbf16>, vector<4x8x16xf32> -> vector<4x8x16xf32>
    "tpu.trace_stop"() : () -> ()
    %57 = arith.truncf %56 : vector<4x8x16xf32> to vector<4x8x16xbf16>
    %58 = tpu.transpose %57, [1, 0, 2] : vector<4x8x16xbf16> -> vector<8x4x16xbf16>
    %59 = vector.shape_cast %58 : vector<8x4x16xbf16> to vector<8x64xbf16>
    %c0_23 = arith.constant 0 : index
    %c0_24 = arith.constant 0 : index
    %60 = vector.load %arg8[%c0_23, %c0_24] : memref<64x32xbf16, #tpu.memory_space<vmem>>, vector<64x32xbf16>
    %cst_25 = arith.constant dense<0.000000e+00> : vector<8x32xf32>
    %61 = tpu.matmul %59, %60, %cst_25 {dimension_numbers = #tpu.dot_dimension_numbers<[1], [0], [0], [1], [0, 0, 1, 1], [], []>} : vector<8x64xbf16>, vector<64x32xbf16>, vector<8x32xf32> -> vector<8x32xf32>
    %c0_26 = arith.constant 0 : index
    %c0_27 = arith.constant 0 : index
    %62 = vector.load %arg9[%c0_26, %c0_27] : memref<1x32xf32, #tpu.memory_space<vmem>>, vector<1x32xf32>
    %63 = vector.shape_cast %62 : vector<1x32xf32> to vector<32xf32>
    %64 = vector.shape_cast %63 : vector<32xf32> to vector<1x32xf32>
    %65 = vector.broadcast %64 : vector<1x32xf32> to vector<8x32xf32>
    %66 = arith.addf %61, %65 : vector<8x32xf32>
    %c0_28 = arith.constant 0 : index
    %c0_29 = arith.constant 0 : index
    %c0_30 = arith.constant 0 : index
    %67 = vector.load %arg10[%c0_28, %c0_29, %c0_30] : memref<1x8x32xf32, #tpu.memory_space<vmem>>, vector<1x8x32xf32>
    %68 = vector.shape_cast %67 : vector<1x8x32xf32> to vector<8x32xf32>
    %69 = vector.shape_cast %66 : vector<8x32xf32> to vector<1x8x32xf32>
    tpu.vector_store %arg10[%c0_28, %c0_29, %c0_30], %69 {strides = array<i32>} : memref<1x8x32xf32, #tpu.memory_space<vmem>>, vector<1x8x32xf32>,
    return
  }
  func.func @transform_0(%arg0: i32, %arg1: i32) -> (i32, i32, i32) {
    %c0_i32 = arith.constant 0 : i32
    %c0_i32_0 = arith.constant 0 : i32
    %c0_i32_1 = arith.constant 0 : i32
    return %arg0, %c0_i32, %c0_i32_0 : i32, i32, i32
  }
  func.func @transform_1(%arg0: i32, %arg1: i32) -> (i32, i32) {
    %c0_i32 = arith.constant 0 : i32
    %c0_i32_0 = arith.constant 0 : i32
    %c0_i32_1 = arith.constant 0 : i32
    return %c0_i32, %c0_i32_0 : i32, i32
  }
  func.func @transform_2(%arg0: i32, %arg1: i32) -> (i32, i32) {
    %c0_i32 = arith.constant 0 : i32
    %c0_i32_0 = arith.constant 0 : i32
    %c0_i32_1 = arith.constant 0 : i32
    return %c0_i32, %c0_i32_0 : i32, i32
  }
  func.func @transform_3(%arg0: i32, %arg1: i32) -> (i32, i32) {
    %c0_i32 = arith.constant 0 : i32
    %c0_i32_0 = arith.constant 0 : i32
    %c0_i32_1 = arith.constant 0 : i32
    return %c0_i32, %c0_i32_0 : i32, i32
  }
  func.func @transform_4(%arg0: i32, %arg1: i32) -> (i32, i32) {
    %c0_i32 = arith.constant 0 : i32
    %c0_i32_0 = arith.constant 0 : i32
    %c0_i32_1 = arith.constant 0 : i32
    return %c0_i32, %c0_i32_0 : i32, i32
  }
  func.func @transform_5(%arg0: i32, %arg1: i32) -> (i32, i32) {
    %c0_i32 = arith.constant 0 : i32
    %c0_i32_0 = arith.constant 0 : i32
    %c0_i32_1 = arith.constant 0 : i32
    return %c0_i32, %c0_i32_0 : i32, i32
  }
  func.func @transform_6(%arg0: i32, %arg1: i32) -> (i32, i32) {
    %c0_i32 = arith.constant 0 : i32
    %c0_i32_0 = arith.constant 0 : i32
    %c0_i32_1 = arith.constant 0 : i32
    return %c0_i32, %c0_i32_0 : i32, i32
  }
  func.func @transform_7(%arg0: i32, %arg1: i32) -> (i32, i32) {
    %c0_i32 = arith.constant 0 : i32
    %c0_i32_0 = arith.constant 0 : i32
    %c0_i32_1 = arith.constant 0 : i32
    return %c0_i32, %c0_i32_0 : i32, i32
  }
  func.func @transform_8(%arg0: i32, %arg1: i32) -> (i32, i32, i32) {
    %c0_i32 = arith.constant 0 : i32
    %c0_i32_0 = arith.constant 0 : i32
    return %arg0, %arg1, %c0_i32 : i32, i32, i32
  }
}

</mosaic_0001>

<bundles_post_ra>
// kernel: tpu_custom_call.1
= control target key start
LH: loop header
LB: loop body
LE: loop exit
PB: predicated region body
PF: predicated region fallthrough
CT: control target
= control target key end

     0   :  { %13 = vsyncpa [#allocation3], 0  ;;  %s2616_s0 = inlined_call_operand.vmem [shape: f32[2,8,32], index: 0, kind: input, shape index: {}]   ;;  %s2617_s1 = inlined_call_operand.vmem [shape: f32[1,32], index: 1, kind: input, shape index: {}]   ;;  %s2618_s2 = inlined_call_operand.vmem [shape: f32[1,32], index: 2, kind: input, shape index: {}]   ;;  %s2619_s3 = inlined_call_operand.vmem [shape: bf16[32,64], index: 3, kind: input, shape index: {}]   ;;  %s2620_s4 = inlined_call_operand.vmem [shape: bf16[32,64], index: 4, kind: input, shape index: {}]   ;;  %s2621_s5 = inlined_call_operand.hbm [shape: bf16[32,64], index: 5, kind: input, shape index: {}]   ;;  %s2622_s6 = inlined_call_operand.vmem [shape: bf16[64,32], index: 6, kind: input, shape index: {}]   ;;  %s2623_s7 = inlined_call_operand.vmem [shape: f32[1,32], index: 7, kind: input, shape index: {}]   ;;  %s2624_s8 = inlined_call_operand.hbm [shape: f32[2,8,32], index: 8, kind: output, shape index: {}]  }
   0x1   :  { %14 = vsyncpa [#allocation4], 0 }
   0x2   :  { %16 = vsyncpa [#allocation4 + $0x1], 0  ;;  %s2246_s27 = smov 0   ;;  %s2248_s28 = smov 0  }
   0x3   :  { %s2250_s29 = smov 0   ;;  %s2252_s30 = smov 0  }
   0x4   :  { %s2254_s9 = smov 0   ;;  %s2256_s10 = smov 0  }
   0x5 LB: > { %s1815_s11 = sadd.s32 4294967295, %s2184_s10   ;;  %s1816_s12 = sadd.s32 4294967294, %s2184_s10   ;;  %s2184_s10 = sphi %s2256_s10, %s22_s10   ;;  %s2180_s9 = sphi %s2254_s9, %s2642_s9   ;;  %s2176_s30 = sphi %s2252_s30, %s2641_s30   ;;  %s2172_s29 = sphi %s2250_s29, %s2640_s29   ;;  %s2168_s28 = sphi %s2248_s28, %s2639_s28   ;;  %s2164_s27 = sphi %s2246_s27, %s2638_s27  }
   0x6   : > { %s34_s13 = sadd.s32 1, %s2180_s9  ;;  %s216_s14 = sadd.s32 1, %s2172_s29 }
   0x7   : > { %p36_p0 = scmp.ge.s32.totalorder %s34_s13, 2  ;;  %p226_p1 = scmp.ne.s32.totalorder %s2172_s29, %s2168_s28 }
   0x8   : > { %p227_p2 = scmp.eq.s32.totalorder %s1815_s11, 1  ;;  %p232_p3 = scmp.ne.s32.totalorder %s2168_s28, %s2164_s27 }
   0x9   : > { %s2644_s13 = smov (%p36_p0, %s34_s13), 0  ;;  %p233_p5 = scmp.eq.s32.totalorder %s1816_s12, 1 }
   0xa   : > { %p2286_p4 = por %p227_p2, %p226_p1  ;;  %s211_s16 = ssub.s32 %s2180_s9, %s2644_s13 }
   0xb   : > { %p1817_p6 = scmp.ge.s32.totalorder %s2184_s10, 1  ;;  %p214_p7 = scmp.eq.s32.totalorder %s211_s16, 0 }
   0xc   : > { %s2629_s15 = scalar_select %p2286_p4, 1, 0 }
   0xd   : > { %p2293_p8 = por %p233_p5, %p232_p3  ;;  %p240_p9 = scmp.lt.s32.totalorder %s2184_s10, 3 }
   0xe   : > { %s2299_s18 = scalar_select %p214_p7, %s2172_s29, %s216_s14  }
   0xf   : > { %s2630_s17 = scalar_select %p2293_p8, 1, 0 }
  0x10   : > { %p2301_p10 = pnand %p1817_p6, %p240_p9  ;;  %p2305_p11 = scmp.eq.s32.totalorder %s1815_s11, 0 }
  0x11   : > { %s2186_s21 = smov [#allocation2]   ;;  %s2074_s26 = scalar_lea.hbm %s2621_s5, 256 }
  0x12   : > { %s2631_s19 = scalar_select %p2301_p10, 1, 0 }
  0x13   : > { %s2632_s20 = scalar_select %p2305_p11, 1, 0 }
  0x14   : > { %p1973_p12 = pneg %p2301_p10  ;;  %s264_s22 = sshll.u32 %s2186_s21, 4  ;;  %s265_s22 = int_to_ptr.vmem [resolvable:$true] %s264_s22 }
  0x15   : > { %p2075_p0 = scmp.ne.s32.totalorder %s2621_s5, %s2074_s26  ;;  %p2081_p5 = scmp.lt.u32.totalorder %s2074_s26, %s2621_s5 }
  0x16   : > { %p2313_p13 = pnand %p2305_p11, %p1973_p12 }
  0x18   : > { %p2076_p1 = pneg %p2313_p13 }
  0x1a   : > { %p2077_p2 = pnand %p2076_p1, %p2075_p0 }
  0x1c   : > { %p2078_p3 = pneg %p2077_p2 }
  0x1e   : > { %p2083_p6 = pnand %p2081_p5, %p2078_p3 }
  0x20   : > { %2086 = shalt.err (!%p2083_p6)
}
  0x21   : > { %s2087_s21 = scalar_lea.vmem %s265_s22, 256  ;;  %p2095_p8 = scmp.lt.s32.totalorder %s265_s22, %s265_s22 }
  0x22   : > { %p2088_p7 = scmp.ne.s32.totalorder %s265_s22, %s2087_s21  ;;  %p2096_p4 = scmp.lt.s32.totalorder %s2087_s21, %s2087_s21 }
  0x24   : > { %p2090_p9 = pnand %p2088_p7, %p2076_p1  ;;  %p2097_p11 = por %p2096_p4, %p2095_p8 }
  0x26   : > { %p2091_p12 = pneg %p2090_p9 }
  0x28   : > { %p2098_p10 = pnand %p2097_p11, %p2091_p12 }
  0x2a   : > { %2101 = shalt.err (!%p2098_p10)
}
  0x2b   : > { %s2187_s24 = smov 64   ;;  %s2188_s25 = smov 4  }
  0x2c   : > { %1976 = dma.hbm_to_vmem [thread:$0]  (!%p2313_p13), %s2621_s5, 256, %s265_s22, [#allocation3], %s2187_s24, %s2187_s24, %s2188_s25  }
  0x2d   : > { %p2634_p0 = scmp.ne.s32.totalorder %s2631_s19, 0 }
  0x2e   : > { %p2635_p2 = scmp.ne.s32.totalorder (!%p2634_p0), %s2632_s20, 0 }
  0x2f   : > { %293 = sbr.rel (%p2634_p0) target bundleno = 1915 (0x77b), region = 52 }
  0x36   : > { %2155 = dma.done.wait (%p2635_p2), [#allocation3], 256  }
  0x37   : > { %2157 = vsyncadd (%p2635_p2), [#allocation3], 4294967040  ;;  %p326_p4 = scmp.lt.s32.totalorder %s2176_s30, 1  ;;  %vm334_vm0 = vcmask 261120   ;;  %v2046_v7 = vld [vmem:[%s2619_s3] sm:$0xff]   ;;  %v2189_v9 = vmov 0.0   ;;  %v434_v40 = vlaneseq }
  0x38   : > { %v2047_v8 = vld [vmem:[%s2620_s4] sm:$0xff]   ;;  %1883 = vmatprep.subr.bf16.mxu0 %v2189_v9  ;;  %1891 = vmatprep.subr.bf16.mxu1 %v2189_v9  ;;  %v2048_v10 = vld [vmem:[%s2619_s3 + $0x8] sm:$0xff]   ;;  %vm2190_vm1 = vmmov 0   ;;  %s2191_s19 = smov 80   ;;  %s2192_s20 = smov 112   ;;  %v2196_v59 = vmov 0  }
  0x39   : > { %s327_s26 = scalar_select %p326_p4, %s2176_s30, 1  ;;  %1884 = vmatpush3.bf16.msra.mxu0 %v2046_v7  ;;  %1892 = vmatpush3.bf16.msra.mxu1 %v2047_v8  ;;  %v2049_v11 = vld [vmem:[%s2620_s4 + $0x8] sm:$0xff]   ;;  %v1824_v16 = vld [vmem:[%s2617_s1] ss:$0 sm:$0xff]  ;;  %v2194_v38 = vmov 1983009808  }
  0x3a   : > { %1885 = vmatprep.subr.bf16.mxu0 %v2189_v9  ;;  %1893 = vmatprep.subr.bf16.mxu1 %v2189_v9  ;;  %v1825_v18 = vld [vmem:[%s2618_s2] ss:$0 sm:$0xff]  ;;  %v2051_v23 = vld [vmem:[#allocation2 + $0x8] sm:$0xff]   ;;  %s2193_s22 = smov 96   ;;  %v432_v39 = vunpack.c.l.s4 %v2194_v38  ;;  %v2195_v41 = vmov 1934713408  }
  0x3b   : > { %s1823_s14 = sshll.u32 %s327_s26, 3  ;;  %1887 = vmatprep.mubr.msk.bf16.mxu0 %vm2190_vm1, %v2189_v9  ;;  %1895 = vmatprep.mubr.msk.bf16.mxu1 %vm2190_vm1, %v2189_v9  ;;  %v2050_v21 = vld [vmem:[#allocation2] sm:$0xff]   ;;  %v449_v42 = vunpack.c.l.s4 %v2195_v41  ;;  %v435_v44 = vshrl.u32 %v434_v40, 7  ;;  %vm1042_vm2 = vcmask 130048   ;;  %vm1227_vm3 = vcmask 64512   ;;  %s1850_s12 = sshll.u32 %s2176_s30, 7 }
  0x3c   : > { %s329_s21 = scalar_lea.vmem %s2616_s0, %s1823_s14  ;;  %v433_v43 = vunpack.c.0.s8 %v432_v39  ;;  %vm1279_vm4 = vcmask 1043456   ;;  %vm1634_vm5 = vcmask 392192   ;;  %vm1676_vm6 = vcmask 523264   ;;  %p2636_p10 = scmp.ne.s32.totalorder %s2629_s15, 0 }
  0x3d   : > { %v331_v0 = vld [vmem:[%s329_s21] sm:$0xff]  ;;  %1886 = vmatpush3.bf16.msra.mxu0 %v2048_v10  ;;  %1894 = vmatpush3.bf16.msra.mxu1 %v2049_v11  ;;  %v450_v45 = vunpack.c.0.s8 %v449_v42  ;;  %s2197_s21 = smov 16  }
  0x3e   : > { %v335_v1 = vsel %vm334_vm0, %v331_v0, 0.0  ;;  %1899 = vmatprep.subr.bf16.mxu0 %v2189_v9  ;;  %1907 = vmatprep.subr.bf16.mxu1 %v2189_v9  ;;  %v2393_v46 = vsub.s32 %v433_v43, %v435_v44 }
  0x3f   : > { %336 = vadd.xlane.f32.xlu0 %v335_v1  ;;  %v2396_v50 = vsub.s32 %v450_v45, %v435_v44 }
  0xcc   : > { %v337_v2 = vpop.xlane.xlu0 %336 }
  0xcd   : > { %v339_v3 = vmul.f32 0.03125, %v337_v2 }
  0xcf   : > { %v340_v4 = vsub.f32 %v331_v0, %v339_v3 }
  0xd1   : > { %v341_v5 = vmul.f32 %v340_v4, %v340_v4 }
  0xd3   : > { %v342_v6 = vsel %vm334_vm0, %v341_v5, 0.0 }
  0xd4   : > { %343 = vadd.xlane.f32.xlu0 %v342_v6 }
 0x161   : > { %v344_v12 = vpop.xlane.xlu0 %343 }
 0x162   : > { %v345_v13 = vmul.f32 0.03125, %v344_v12 }
 0x164   : > { %v346_v14 = vadd.f32 1e-05, %v345_v13 }
 0x166   : > { %2056 = vrsqrt.f32 %v346_v14 }
 0x170   : > { %v2057_v15 = vpop.eup %2056 }
 0x171   : > { %v348_v17 = vmul.f32 %v2057_v15, %v340_v4 }
 0x173   : > { %v355_v19 = vmul.f32 %v1824_v16, %v348_v17 }
 0x175   : > { %v362_v20 = vadd.f32 %v1825_v18, %v355_v19 }
 0x177   : > { %v363_v22 = vpack.c.bf16 %v362_v20, %v362_v20 }
 0x179   : > { %1888 = vmatmul.mubr.msk.bf16.vlgmr.msra.gmra.mrb[0].mxu0 %vm334_vm0, %v363_v22  ;;  %1896 = vmatmul.mubr.msk.bf16.vlgmr.msra.gmra.mrb[0].mxu1 %vm334_vm0, %v363_v22 }
 0x17a   : > { %1900 = vmatpush3.bf16.msra.mxu0 %v2050_v21  ;;  %1903 = vmatprep.mubr.msk.bf16.mxu0 %vm2190_vm1, %v2189_v9 }
 0x17b   : > { %1901 = vmatprep.subr.bf16.mxu0 %v2189_v9  ;;  %1909 = vmatprep.mubr.msk.bf16.mxu1 %vm2190_vm1, %v2189_v9 }
 0x17e   : > { %1902 = vmatpush3.bf16.msra.mxu0 %v2051_v23 }
 0x17f   : > { %1913 = vmatprep.subr.bf16.mxu0 %v2189_v9 }
 0x181   : > { %1904 = vmatmul.mubr.msk.bf16.vlgmr.msra.gmra.mrb[4].mxu0 %vm334_vm0, %v363_v22 }
 0x182   : > { %1915 = vmatprep.mubr.msk.bf16.mxu0 %vm2190_vm1, %v2189_v9 }
 0x24c   : > { %v417_v24 = vpop.f32.mrb[0].mxu0  ;;  %v642_v25 = vpop.f32.mrb[0].mxu1 }
 0x24d   : > { %v648_v26 = vpack.c.bf16 %v642_v25, %v642_v25  ;;  %v1889_v27 = vpop.f32.mrb[1].mxu0  ;;  %v1897_v28 = vpop.f32.mrb[1].mxu1  ;;  %v423_v34 = vpack.c.bf16 %v417_v24, %v417_v24 }
 0x24e   : > { %v420_v29 = vpop.f32.mrb[2].mxu0  ;;  %v645_v30 = vpop.f32.mrb[2].mxu1 }
 0x24f   : > { %654 = vrot.lane.b32.xlu0 %v648_v26, %s2191_s19  ;;  %650 = vrot.lane.b32.xlu1 %v648_v26, %s2192_s20  ;;  %v1890_v31 = vpop.f32.mrb[3].mxu0  ;;  %v1898_v32 = vpop.f32.mrb[3].mxu1  ;;  %v662_v58 = vrot.slane %v648_v26, %v2393_v46  ;;  %v437_v6 = vrot.slane %v423_v34, %v2393_v46 }
 0x253   : > { %652 = vrot.lane.b32.xlu1 %v648_v26, %s2193_s22 }
 0x254   : > { %v2388_v33 = vpop.f32.mrb[4].mxu0 }
 0x255   : > { %v1905_v35 = vpop.f32.mrb[5].mxu0 }
 0x256   : > { %v870_v36 = vpop.f32.mrb[6].mxu0 }
 0x257   : > { %425 = vrot.lane.b32.xlu1 %v423_v34, %s2192_s20  ;;  %v1906_v37 = vpop.f32.mrb[7].mxu0 }
 0x25b   : > { %427 = vrot.lane.b32.xlu1 %v423_v34, %s2193_s22 }
 0x25f   : > { %429 = vrot.lane.b32.xlu1 %v423_v34, %s2191_s19 }
 0x2c1   : > { %v655_v47 = vpop.permute.xlu0 %654  ;;  %v651_v48 = vpop.permute.xlu1 %650 }
 0x2c2   : > { %v704_v49 = vrot.slane %v655_v47, %v2393_v46  ;;  %v696_v51 = vrot.slane %v651_v48, %v2393_v46 }
 0x2c4   : > { %v705_v52 = vcombine.low %v696_v51, %v704_v49  ;;  %v706_v53 = vcombine.high %v696_v51, %v704_v49 }
 0x2c5   : > { %v653_v54 = vpop.permute.xlu1 %652 }
 0x2c6   : > { %v713_v55 = vrot.slane %v705_v52, %v2396_v50  ;;  %v720_v56 = vrot.slane %v706_v53, %v2396_v50  ;;  %v670_v57 = vrot.slane %v653_v54, %v2393_v46 }
 0x2c8   : > { %v721_v60 = vcombine.high %v713_v55, %v2196_v59  ;;  %v671_v61 = vcombine.low %v662_v58, %v670_v57  ;;  %v672_v62 = vcombine.high %v662_v58, %v670_v57  ;;  %v722_v0 = vcombine.high %v720_v56, %v2196_v59 }
 0x2c9   : > { %v426_v63 = vpop.permute.xlu1 %425  ;;  %v728_v3 = vshrl.u32 %v713_v55, 16  ;;  %v744_v5 = vshrl.u32 %v720_v56, 16 }
 0x2ca   : > { %v679_v1 = vrot.slane %v671_v61, %v2396_v50  ;;  %v686_v2 = vrot.slane %v672_v62, %v2396_v50  ;;  %v736_v4 = vshrl.u32 %v721_v60, 16  ;;  %v752_v13 = vshrl.u32 %v722_v0, 16 }
 0x2cb   : > { %v471_v32 = vrot.slane %v426_v63, %v2393_v46 }
 0x2cc   : > { %v687_v7 = vcombine.high %v679_v1, %v2196_v59  ;;  %v688_v8 = vcombine.high %v686_v2, %v2196_v59  ;;  %v725_v10 = vpack.i.b16 %v713_v55, %v679_v1  ;;  %v727_v11 = vshrl.u32 %v679_v1, 16 }
 0x2cd   : > { %v428_v12 = vpop.permute.xlu1 %427  ;;  %v741_v14 = vpack.i.b16 %v720_v56, %v686_v2  ;;  %v743_v15 = vshrl.u32 %v686_v2, 16 }
 0x2ce   : > { %v445_v16 = vrot.slane %v428_v12, %v2393_v46  ;;  %v729_v17 = vpack.i.b16 %v728_v3, %v727_v11  ;;  %v733_v18 = vpack.i.b16 %v721_v60, %v687_v7  ;;  %v735_v19 = vshrl.u32 %v687_v7, 16 }
 0x2cf   : > { %v749_v20 = vpack.i.b16 %v722_v0, %v688_v8  ;;  %v745_v21 = vpack.i.b16 %v744_v5, %v743_v15  ;;  %v751_v22 = vshrl.u32 %v688_v8, 16  ;;  %v755_v23 = vcombine.low %v725_v10, %v741_v14 }
 0x2d0   : > { %v446_v24 = vcombine.low %v437_v6, %v445_v16  ;;  %v737_v25 = vpack.i.b16 %v736_v4, %v735_v19  ;;  %v447_v27 = vcombine.high %v437_v6, %v445_v16 }
 0x2d1   : > { %v763_v26 = vcombine.low %v733_v18, %v749_v20  ;;  %v430_v28 = vpop.permute.xlu1 %429  ;;  %v753_v29 = vpack.i.b16 %v752_v13, %v751_v22  ;;  %v780_v30 = vcombine.low %v729_v17, %v745_v21  ;;  %v762_v37 = vrot.slane %v755_v23, %v2393_v46 }
 0x2d2   : > { %v454_v31 = vrot.slane %v446_v24, %v2396_v50  ;;  %v461_v34 = vrot.slane %v447_v27, %v2396_v50  ;;  %v479_v35 = vrot.slane %v430_v28, %v2393_v46 }
 0x2d3   : > { %v770_v36 = vrot.slane %v763_v26, %v2393_v46  ;;  %v788_v38 = vcombine.low %v737_v25, %v753_v29  ;;  %v787_v44 = vrot.slane %v780_v30, %v2393_v46 }
 0x2d4   : > { %v462_v39 = vcombine.high %v454_v31, %v2196_v59  ;;  %v480_v40 = vcombine.low %v471_v32, %v479_v35  ;;  %v481_v41 = vcombine.high %v471_v32, %v479_v35  ;;  %v463_v42 = vcombine.high %v461_v34, %v2196_v59 }
 0x2d5   : > { %v771_v43 = vcombine.low %v762_v37, %v770_v36  ;;  %v795_v45 = vrot.slane %v788_v38, %v2393_v46  ;;  %v502_v47 = vshrl.u32 %v454_v31, 16  ;;  %v518_v52 = vshrl.u32 %v461_v34, 16 }
 0x2d6   : > { %v488_v48 = vrot.slane %v480_v40, %v2396_v50  ;;  %v495_v49 = vrot.slane %v481_v41, %v2396_v50  ;;  %v510_v51 = vshrl.u32 %v462_v39, 16  ;;  %v526_v60 = vshrl.u32 %v463_v42, 16 }
 0x2d7   : > { %v778_v53 = vrot.slane %v771_v43, %v2396_v50  ;;  %v796_v54 = vcombine.low %v787_v44, %v795_v45 }
 0x2d8   : > { %v496_v55 = vcombine.high %v488_v48, %v2196_v59  ;;  %v497_v56 = vcombine.high %v495_v49, %v2196_v59  ;;  %v500_v57 = vpack.i.b16 %v488_v48, %v454_v31  ;;  %v503_v58 = vshrl.u32 %v488_v48, 16 }
 0x2d9   : > { %v516_v61 = vpack.i.b16 %v495_v49, %v461_v34  ;;  %v519_v62 = vshrl.u32 %v495_v49, 16  ;;  %v803_v63 = vrot.slane %v796_v54, %v2396_v50  ;;  %v808_v11 = vshrl.u32 %v778_v53, 16 }
 0x2da   : > { %v504_v0 = vpack.i.b16 %v503_v58, %v502_v47  ;;  %v508_v1 = vpack.i.b16 %v496_v55, %v462_v39  ;;  %v511_v2 = vshrl.u32 %v496_v55, 16  ;;  %v524_v3 = vpack.i.b16 %v497_v56, %v463_v42 }
 0x2db   : > { %v520_v4 = vpack.i.b16 %v519_v62, %v518_v52  ;;  %v527_v5 = vshrl.u32 %v497_v56, 16  ;;  %v530_v6 = vcombine.low %v500_v57, %v516_v61  ;;  %v807_v7 = vpack.i.b16 %v803_v63, %v778_v53 }
 0x2dc   : > { %v512_v8 = vpack.i.b16 %v511_v2, %v510_v51  ;;  %v538_v10 = vcombine.low %v508_v1, %v524_v3  ;;  %v809_v12 = vshrl.u32 %v803_v63, 16  ;;  %v804_v20 = vcombine.high %v803_v63, %v2196_v59 }
 0x2dd   : > { %v528_v13 = vpack.i.b16 %v527_v5, %v526_v60  ;;  %v555_v14 = vcombine.low %v504_v0, %v520_v4  ;;  %v1047_v15 = vsel %vm1042_vm2, %v807_v7, 0  ;;  %v537_v16 = vrot.slane %v530_v6, %v2393_v46 }
 0x2de   : > { %v545_v17 = vrot.slane %v538_v10, %v2393_v46  ;;  %1908 = vmatpush3.bf16.xpose.msra.mxu1 %v1047_v15  ;;  %v810_v18 = vpack.i.b16 %v809_v12, %v808_v11  ;;  %v779_v25 = vcombine.high %v778_v53, %v2196_v59  ;;  %v815_v28 = vshrl.u32 %v804_v20, 16 }
 0x2df   : > { %v563_v19 = vcombine.low %v512_v8, %v528_v13  ;;  %1919 = vmatprep.subr.bf16.mxu1 %v2189_v9  ;;  %v562_v23 = vrot.slane %v555_v14, %v2393_v46  ;;  %v873_v5 = vpack.c.bf16 %v2388_v33, %v2388_v33 }
 0x2e0   : > { %v546_v21 = vcombine.low %v537_v16, %v545_v17  ;;  %v1093_v22 = vsel %vm1042_vm2, %v810_v18, 0  ;;  %v813_v30 = vpack.i.b16 %v804_v20, %v779_v25  ;;  %v814_v31 = vshrl.u32 %v779_v25, 16 }
 0x2e1   : > { %v570_v24 = vrot.slane %v563_v19, %v2393_v46  ;;  %1914 = vmatpush3.bf16.xpose.msra.mxu0 %v1093_v22 }
 0x2e2   : > { %1925 = vmatprep.subr.bf16.mxu0 %v2189_v9  ;;  %v553_v27 = vrot.slane %v546_v21, %v2396_v50  ;;  %v816_v36 = vpack.i.b16 %v815_v28, %v814_v31  ;;  %v1139_v37 = vsel %vm1042_vm2, %v813_v30, 0  ;;  %v887_v28 = vrot.slane %v873_v5, %v2393_v46 }
 0x2e3   : > { %v571_v26 = vcombine.low %v562_v23, %v570_v24 }
 0x2e4   : > { %v583_v34 = vshrl.u32 %v553_v27, 16  ;;  %v1185_v40 = vsel %vm1042_vm2, %v816_v36, 0  ;;  %v554_v41 = vcombine.high %v553_v27, %v2196_v59 }
 0x2e5   : > { %v578_v29 = vrot.slane %v571_v26, %v2396_v50 }
 0x2e6   : > { %v589_v44 = vshrl.u32 %v554_v41, 16 }
 0x2e7   : > { %v582_v32 = vpack.i.b16 %v578_v29, %v553_v27  ;;  %v584_v35 = vshrl.u32 %v578_v29, 16  ;;  %v579_v39 = vcombine.high %v578_v29, %v2196_v59 }
 0x2e9   : > { %1910 = vmatmul.mubr.msk.bf16.vlgmr.msra.gmra.mrb[4].mxu1 %vm1042_vm2, %v582_v32  ;;  %v585_v38 = vpack.i.b16 %v584_v35, %v583_v34  ;;  %v590_v42 = vshrl.u32 %v579_v39, 16  ;;  %v588_v43 = vpack.i.b16 %v579_v39, %v554_v41 }
 0x2ea   : > { %1920 = vmatpush3.bf16.xpose.msra.mxu1 %v1139_v37  ;;  %1921 = vmatprep.mubr.msk.bf16.mxu1 %vm2190_vm1, %v2189_v9 }
 0x2eb   : > { %1916 = vmatmul.mubr.msk.bf16.vlgmr.msra.gmra.mrb[8].mxu0 %vm1042_vm2, %v585_v38  ;;  %1931 = vmatprep.subr.bf16.mxu1 %v2189_v9  ;;  %v591_v45 = vpack.i.b16 %v590_v42, %v589_v44 }
 0x2ec   : > { %1926 = vmatpush3.bf16.xpose.msra.mxu0 %v1185_v40  ;;  %1927 = vmatprep.mubr.msk.bf16.mxu0 %vm2190_vm1, %v2189_v9 }
 0x2ed   : > { %1937 = vmatprep.subr.bf16.mxu0 %v2189_v9 }
 0x2f1   : > { %1922 = vmatmul.mubr.msk.bf16.vlgmr.msra.gmra.mrb[8].mxu1 %vm1042_vm2, %v588_v43 }
 0x2f2   : > { %1933 = vmatprep.mubr.msk.bf16.mxu1 %vm2190_vm1, %v2189_v9 }
 0x2f3   : > { %1928 = vmatmul.mubr.msk.bf16.vlgmr.msra.gmra.mrb[12].mxu0 %vm1042_vm2, %v591_v45 }
 0x2f4   : > { %1939 = vmatprep.mubr.msk.bf16.mxu0 %vm2190_vm1, %v2189_v9 }
 0x3bc   : > { %v1083_v47 = vpop.f32.mrb[4].mxu1 }
 0x3bd   : > { %v1911_v48 = vpop.f32.mrb[5].mxu1  ;;  %v1228_v49 = vsel %vm1227_vm3, %v1083_v47, -inf }
 0x3be   : > { %1229 = vmax.xlane.f32.xlu1 %v1228_v49  ;;  %v1086_v51 = vpop.f32.mrb[6].mxu1  ;;  %v1129_v52 = vpop.f32.mrb[8].mxu0 }
 0x3bf   : > { %v1912_v53 = vpop.f32.mrb[7].mxu1  ;;  %v1917_v54 = vpop.f32.mrb[9].mxu0  ;;  %v1231_v55 = vsel %vm1227_vm3, %v1129_v52, -inf }
 0x3c0   : > { %1232 = vmax.xlane.f32.xlu0 %v1231_v55  ;;  %v1132_v56 = vpop.f32.mrb[10].mxu0 }
 0x3c1   : > { %v1918_v57 = vpop.f32.mrb[11].mxu0 }
 0x3c4   : > { %v1175_v58 = vpop.f32.mrb[8].mxu1 }
 0x3c5   : > { %v1923_v60 = vpop.f32.mrb[9].mxu1  ;;  %v1234_v61 = vsel %vm1227_vm3, %v1175_v58, -inf }
 0x3c6   : > { %1235 = vmax.xlane.f32.xlu1 %v1234_v61  ;;  %v1178_v62 = vpop.f32.mrb[10].mxu1  ;;  %v1221_v63 = vpop.f32.mrb[12].mxu0 }
 0x3c7   : > { %v1924_v0 = vpop.f32.mrb[11].mxu1  ;;  %v1929_v1 = vpop.f32.mrb[13].mxu0  ;;  %v1237_v4 = vsel %vm1227_vm3, %v1221_v63, -inf }
 0x3c8   : > { %v1224_v2 = vpop.f32.mrb[14].mxu0 }
 0x3c9   : > { %v1930_v3 = vpop.f32.mrb[15].mxu0 }
 0x3ca   : > { %1238 = vmax.xlane.f32.xlu1 %v1237_v4 }
 0x3db   : > { %877 = vrot.lane.b32.xlu1 %v873_v5, %s2193_s22  ;;  %s323_s22 = sand.u32 1, %s2168_s28  }
 0x3dc   : > { %s1822_s24 = sshll.u32 %s323_s22, 3  ;;  %s1721_s30 = scalar_lea.sflag [#allocation4], %s323_s22 }
 0x3dd   : > { %s325_s26 = scalar_lea.vmem [#allocation5], %s1822_s24 }
 0x3de   : > { %s1735_s14 = sshll.u32 %s325_s26, 4  ;;  %s2570_s14 = int_to_ptr.vmem [resolvable:$true] %s1735_s14 }
 0x44b   : > { %v1230_v6 = vpop.xlane.xlu1 %1229 }
 0x44c   : > { %v1240_v7 = vsub.f32 %v1083_v47, %v1230_v6 }
 0x44d   : > { %v1233_v8 = vpop.xlane.xlu0 %1232 }
 0x44e   : > { %v1244_v10 = vmul.f32 1.442695, %v1240_v7  ;;  %v1241_v11 = vsub.f32 %v1129_v52, %v1233_v8 }
 0x450   : > { %2058 = vpow2.f32 %v1244_v10  ;;  %v1246_v12 = vmul.f32 1.442695, %v1241_v11 }
 0x452   : > { %2060 = vpow2.f32 %v1246_v12 }
 0x453   : > { %v1236_v16 = vpop.xlane.xlu1 %1235 }
 0x454   : > { %v1242_v18 = vsub.f32 %v1175_v58, %v1236_v16 }
 0x456   : > { %v1248_v20 = vmul.f32 1.442695, %v1242_v18 }
 0x457   : > { %v1239_v17 = vpop.xlane.xlu1 %1238 }
 0x458   : > { %v1243_v19 = vsub.f32 %v1221_v63, %v1239_v17  ;;  %2062 = vpow2.f32 %v1248_v20 }
 0x45a   : > { %v2464_v13 = vpop.eup %2058  ;;  %v1250_v21 = vmul.f32 1.442695, %v1243_v19 }
 0x45b   : > { %v1252_v14 = vsel %vm1227_vm3, %v2464_v13, 0.0  ;;  %v878_v26 = vpop.permute.xlu1 %877 }
 0x45c   : > { %v2468_v15 = vpop.eup %2060  ;;  %1253 = vadd.xlane.f32.xlu0 %v1252_v14  ;;  %2064 = vpow2.f32 %v1250_v21  ;;  %v895_v27 = vrot.slane %v878_v26, %v2393_v46 }
 0x45d   : > { %v1255_v33 = vsel %vm1227_vm3, %v2468_v15, 0.0 }
 0x45e   : > { %1256 = vadd.xlane.f32.xlu1 %v1255_v33  ;;  %v896_v29 = vcombine.low %v887_v28, %v895_v27  ;;  %v897_v31 = vcombine.high %v887_v28, %v895_v27 }
 0x460   : > { %v904_v34 = vrot.slane %v896_v29, %v2396_v50  ;;  %v911_v36 = vrot.slane %v897_v31, %v2396_v50 }
 0x462   : > { %v2474_v22 = vpop.eup %2062  ;;  %v912_v40 = vcombine.high %v904_v34, %v2196_v59  ;;  %v913_v43 = vcombine.high %v911_v36, %v2196_v59  ;;  %v952_v47 = vshrl.u32 %v904_v34, 16  ;;  %v968_v49 = vshrl.u32 %v911_v36, 16 }
 0x463   : > { %v1258_v24 = vsel %vm1227_vm3, %v2474_v22, 0.0 }
 0x464   : > { %v960_v48 = vshrl.u32 %v912_v40, 16  ;;  %v976_v55 = vshrl.u32 %v913_v43, 16 }
 0x466   : > { %v2476_v23 = vpop.eup %2064 }
 0x467   : > { %v1261_v25 = vsel %vm1227_vm3, %v2476_v23, 0.0 }
 0x46f   : > { %879 = vrot.lane.b32.xlu1 %v873_v5, %s2191_s19  ;;  %s2198_s19 = smov 32  }
 0x472   : > { %875 = vrot.lane.b32.xlu0 %v873_v5, %s2192_s20  ;;  %s2199_s20 = smov 48  }
 0x491   : > { %1259 = vadd.xlane.f32.xlu0 %v1258_v24 }
 0x493   : > { %1262 = vadd.xlane.f32.xlu1 %v1261_v25 }
 0x4e9   : > { %v1254_v30 = vpop.xlane.xlu0 %1253 }
 0x4ea   : > { %2066 = vrcp.f32 %v1254_v30 }
 0x4eb   : > { %v1257_v32 = vpop.xlane.xlu1 %1256 }
 0x4ec   : > { %2068 = vrcp.f32 %v1257_v32 }
 0x4ed   : > { %v876_v35 = vpop.permute.xlu0 %875 }
 0x4ee   : > { %v921_v38 = vrot.slane %v876_v35, %v2393_v46 }
 0x4ef   : > { %v880_v37 = vpop.permute.xlu1 %879 }
 0x4f0   : > { %v929_v39 = vrot.slane %v880_v37, %v2393_v46 }
 0x4f2   : > { %v930_v41 = vcombine.low %v921_v38, %v929_v39  ;;  %v931_v42 = vcombine.high %v921_v38, %v929_v39 }
 0x4f4   : > { %v938_v44 = vrot.slane %v930_v41, %v2396_v50  ;;  %v945_v45 = vrot.slane %v931_v42, %v2396_v50  ;;  %v2067_v33 = vpop.eup %2066 }
 0x4f5   : > { %v1268_v20 = vmul.f32 %v2067_v33, %v2464_v13 }
 0x4f6   : > { %v946_v51 = vcombine.high %v938_v44, %v2196_v59  ;;  %v947_v52 = vcombine.high %v945_v45, %v2196_v59  ;;  %v950_v53 = vpack.i.b16 %v938_v44, %v904_v34  ;;  %v953_v54 = vshrl.u32 %v938_v44, 16  ;;  %v2069_v18 = vpop.eup %2068 }
 0x4f7   : > { %v966_v56 = vpack.i.b16 %v945_v45, %v911_v36  ;;  %v969_v57 = vshrl.u32 %v945_v45, 16  ;;  %v1269_v27 = vmul.f32 %v2069_v18, %v2468_v15  ;;  %v1272_v35 = vpack.c.bf16 %v1268_v20, %v1268_v20 }
 0x4f8   : > { %v954_v58 = vpack.i.b16 %v953_v54, %v952_v47  ;;  %v958_v60 = vpack.i.b16 %v946_v51, %v912_v40  ;;  %v961_v61 = vshrl.u32 %v946_v51, 16  ;;  %v974_v62 = vpack.i.b16 %v947_v52, %v913_v43  ;;  %v2052_v47 = vld [vmem:[%s2622_s6] sm:$0xff]  }
 0x4f9   : > { %v970_v63 = vpack.i.b16 %v969_v57, %v968_v49  ;;  %v977_v0 = vshrl.u32 %v947_v52, 16  ;;  %v980_v1 = vcombine.low %v950_v53, %v966_v56  ;;  %v1273_v37 = vpack.c.bf16 %v1269_v27, %v1269_v27 }
 0x4fa   : > { %v962_v2 = vpack.i.b16 %v961_v61, %v960_v48  ;;  %v988_v3 = vcombine.low %v958_v60, %v974_v62 }
 0x4fb   : > { %v978_v4 = vpack.i.b16 %v977_v0, %v976_v55  ;;  %v1005_v5 = vcombine.low %v954_v58, %v970_v63  ;;  %v987_v6 = vrot.slane %v980_v1, %v2393_v46 }
 0x4fc   : > { %v995_v7 = vrot.slane %v988_v3, %v2393_v46 }
 0x4fd   : > { %v1013_v8 = vcombine.low %v962_v2, %v978_v4  ;;  %v1012_v11 = vrot.slane %v1005_v5, %v2393_v46 }
 0x4fe   : > { %v996_v10 = vcombine.low %v987_v6, %v995_v7 }
 0x4ff   : > { %v1020_v12 = vrot.slane %v1013_v8, %v2393_v46 }
 0x500   : > { %v1003_v14 = vrot.slane %v996_v10, %v2396_v50 }
 0x501   : > { %v1021_v16 = vcombine.low %v1012_v11, %v1020_v12 }
 0x502   : > { %v1004_v17 = vcombine.high %v1003_v14, %v2196_v59  ;;  %v1033_v24 = vshrl.u32 %v1003_v14, 16 }
 0x503   : > { %v1028_v19 = vrot.slane %v1021_v16, %v2396_v50 }
 0x504   : > { %v1039_v28 = vshrl.u32 %v1004_v17, 16 }
 0x505   : > { %v1032_v21 = vpack.i.b16 %v1028_v19, %v1003_v14  ;;  %v1034_v25 = vshrl.u32 %v1028_v19, 16  ;;  %v1029_v26 = vcombine.high %v1028_v19, %v2196_v59 }
 0x507   : > { %v1281_v29 = vsel %vm1279_vm4, %v1032_v21, 0  ;;  %v1035_v30 = vpack.i.b16 %v1034_v25, %v1033_v24  ;;  %v1038_v31 = vpack.i.b16 %v1029_v26, %v1004_v17  ;;  %v1040_v32 = vshrl.u32 %v1029_v26, 16 }
 0x508   : > { %1932 = vmatpush3.bf16.msra.mxu1 %v1281_v29 }
 0x509   : > { %v1327_v34 = vsel %vm1279_vm4, %v1035_v30, 0  ;;  %1943 = vmatprep.subr.bf16.mxu1 %v2189_v9  ;;  %v1041_v13 = vpack.i.b16 %v1040_v32, %v1039_v28  ;;  %v1373_v36 = vsel %vm1279_vm4, %v1038_v31, 0 }
 0x50a   : > { %1938 = vmatpush3.bf16.msra.mxu0 %v1327_v34 }
 0x50b   : > { %1934 = vmatmul.mubr.msk.bf16.vlgmr.msra.gmra.mrb[12].mxu1 %vm1227_vm3, %v1272_v35  ;;  %1949 = vmatprep.subr.bf16.mxu0 %v2189_v9  ;;  %v1419_v15 = vsel %vm1279_vm4, %v1041_v13, 0 }
 0x50c   : > { %1944 = vmatpush3.bf16.msra.mxu1 %v1373_v36  ;;  %1945 = vmatprep.mubr.msk.bf16.mxu1 %vm2190_vm1, %v2189_v9 }
 0x50d   : > { %1940 = vmatmul.mubr.msk.bf16.vlgmr.msra.gmra.mrb[16].mxu0 %vm1227_vm3, %v1273_v37  ;;  %1955 = vmatprep.subr.bf16.mxu1 %v2189_v9 }
 0x50e   : > { %1950 = vmatpush3.bf16.msra.mxu0 %v1419_v15  ;;  %1951 = vmatprep.mubr.msk.bf16.mxu0 %vm2190_vm1, %v2189_v9 }
 0x51e   : > { %v1260_v38 = vpop.xlane.xlu0 %1259 }
 0x51f   : > { %2070 = vrcp.f32 %v1260_v38 }
 0x520   : > { %v1263_v39 = vpop.xlane.xlu1 %1262 }
 0x521   : > { %2072 = vrcp.f32 %v1263_v39 }
 0x529   : > { %v2071_v40 = vpop.eup %2070 }
 0x52a   : > { %v1270_v41 = vmul.f32 %v2071_v40, %v2474_v22  ;;  %v2053_v22 = vld [vmem:[%s2622_s6 + $0x8] sm:$0xff]  }
 0x52b   : > { %v2073_v42 = vpop.eup %2072 }
 0x52c   : > { %v1271_v43 = vmul.f32 %v2073_v42, %v2476_v23  ;;  %v1274_v44 = vpack.c.bf16 %v1270_v41, %v1270_v41  ;;  %v2054_v23 = vld [vmem:[%s2622_s6 + $0x10] sm:$0xff]  }
 0x52e   : > { %1946 = vmatmul.mubr.msk.bf16.vlgmr.msra.gmra.mrb[16].mxu1 %vm1227_vm3, %v1274_v44  ;;  %v1275_v45 = vpack.c.bf16 %v1271_v43, %v1271_v43 }
 0x52f   : > { %1963 = vmatprep.mubr.msk.bf16.mxu1 %vm2190_vm1, %v2189_v9  ;;  %1956 = vmatpush3.bf16.msra.mxu1 %v2052_v47  ;;  %v2055_v47 = vld [vmem:[%s2622_s6 + $0x18] sm:$0xff]  }
 0x530   : > { %1952 = vmatmul.mubr.msk.bf16.vlgmr.msra.gmra.mrb[20].mxu0 %vm1227_vm3, %v1275_v45  ;;  %1957 = vmatprep.subr.bf16.mxu1 %v2189_v9 }
 0x533   : > { %1958 = vmatpush3.bf16.msra.mxu1 %v2053_v22 }
 0x534   : > { %1959 = vmatprep.subr.bf16.mxu1 %v2189_v9 }
 0x537   : > { %1960 = vmatpush3.bf16.msra.mxu1 %v2054_v23 }
 0x538   : > { %1961 = vmatprep.subr.bf16.mxu1 %v2189_v9 }
 0x53b   : > { %1962 = vmatpush3.bf16.msra.mxu1 %v2055_v47 }
 0x5de   : > { %v1317_v48 = vpop.f32.mrb[12].mxu1 }
 0x5df   : > { %v1935_v49 = vpop.f32.mrb[13].mxu1  ;;  %v1461_v57 = vpack.c.bf16 %v1317_v48, %v1317_v48 }
 0x5e0   : > { %v1320_v51 = vpop.f32.mrb[14].mxu1  ;;  %v1363_v52 = vpop.f32.mrb[16].mxu0 }
 0x5e1   : > { %v1936_v53 = vpop.f32.mrb[15].mxu1  ;;  %v1941_v54 = vpop.f32.mrb[17].mxu0  ;;  %v1495_v60 = vpack.c.bf16 %v1363_v52, %v1363_v52  ;;  %v1468_v1 = vrot.slane %v1461_v57, %v2393_v46 }
 0x5e2   : > { %v1366_v55 = vpop.f32.mrb[18].mxu0 }
 0x5e3   : > { %v1942_v56 = vpop.f32.mrb[19].mxu0  ;;  %v1502_v6 = vrot.slane %v1495_v60, %v2393_v46 }
 0x601   : > { %v1409_v58 = vpop.f32.mrb[16].mxu1 }
 0x602   : > { %v1469_v61 = vpack.c.bf16 %v1409_v58, %v1409_v58  ;;  %v1947_v62 = vpop.f32.mrb[17].mxu1 }
 0x603   : > { %v1412_v63 = vpop.f32.mrb[18].mxu1  ;;  %v1455_v0 = vpop.f32.mrb[20].mxu0 }
 0x604   : > { %v1476_v2 = vrot.slane %v1469_v61, %v2393_v46  ;;  %v1503_v9 = vpack.c.bf16 %v1455_v0, %v1455_v0  ;;  %v1948_v3 = vpop.f32.mrb[19].mxu1  ;;  %v1953_v4 = vpop.f32.mrb[21].mxu0 }
 0x605   : > { %v1458_v5 = vpop.f32.mrb[22].mxu0 }
 0x606   : > { %v1477_v7 = vcombine.low %v1468_v1, %v1476_v2  ;;  %v1478_v8 = vcombine.high %v1468_v1, %v1476_v2  ;;  %v1510_v10 = vrot.slane %v1503_v9, %v2393_v46  ;;  %v1954_v11 = vpop.f32.mrb[23].mxu0  ;;  %v1843_v9 = vld [vmem:[%s2623_s7] ss:$0 sm:$0xff] }
 0x608   : > { %v1485_v12 = vrot.slane %v1477_v7, %v2396_v50  ;;  %v1492_v14 = vrot.slane %v1478_v8, %v2396_v50  ;;  %v1511_v33 = vcombine.low %v1502_v6, %v1510_v10  ;;  %v1512_v16 = vcombine.high %v1502_v6, %v1510_v10 }
 0x60a   : > { %v1493_v17 = vcombine.high %v1485_v12, %v2196_v59  ;;  %v1519_v18 = vrot.slane %v1511_v33, %v2396_v50  ;;  %v1526_v19 = vrot.slane %v1512_v16, %v2396_v50  ;;  %v1494_v20 = vcombine.high %v1492_v14, %v2196_v59 }
 0x60b   : > { %v1533_v21 = vshrl.u32 %v1485_v12, 16  ;;  %v1549_v29 = vshrl.u32 %v1492_v14, 16 }
 0x60c   : > { %v1527_v24 = vcombine.high %v1519_v18, %v2196_v59  ;;  %v1528_v25 = vcombine.high %v1526_v19, %v2196_v59  ;;  %v1531_v26 = vpack.i.b16 %v1519_v18, %v1485_v12  ;;  %v1534_v27 = vshrl.u32 %v1519_v18, 16 }
 0x60d   : > { %v1541_v28 = vshrl.u32 %v1493_v17, 16  ;;  %v1547_v30 = vpack.i.b16 %v1526_v19, %v1492_v14  ;;  %v1550_v31 = vshrl.u32 %v1526_v19, 16  ;;  %v1557_v36 = vshrl.u32 %v1494_v20, 16 }
 0x60e   : > { %v1535_v32 = vpack.i.b16 %v1534_v27, %v1533_v21  ;;  %v1539_v34 = vpack.i.b16 %v1527_v24, %v1493_v17  ;;  %v1542_v35 = vshrl.u32 %v1527_v24, 16  ;;  %v1555_v13 = vpack.i.b16 %v1528_v25, %v1494_v20 }
 0x60f   : > { %v1551_v37 = vpack.i.b16 %v1550_v31, %v1549_v29  ;;  %v1558_v15 = vshrl.u32 %v1528_v25, 16  ;;  %v1561_v38 = vcombine.low %v1531_v26, %v1547_v30 }
 0x610   : > { %v1543_v39 = vpack.i.b16 %v1542_v35, %v1541_v28  ;;  %v1569_v40 = vcombine.low %v1539_v34, %v1555_v13 }
 0x611   : > { %v1559_v41 = vpack.i.b16 %v1558_v15, %v1557_v36  ;;  %v1586_v42 = vcombine.low %v1535_v32, %v1551_v37  ;;  %v1568_v43 = vrot.slane %v1561_v38, %v2393_v46 }
 0x612   : > { %v1576_v44 = vrot.slane %v1569_v40, %v2393_v46 }
 0x613   : > { %v1594_v45 = vcombine.low %v1543_v39, %v1559_v41  ;;  %v1593_v23 = vrot.slane %v1586_v42, %v2393_v46 }
 0x614   : > { %v1577_v22 = vcombine.low %v1568_v43, %v1576_v44 }
 0x615   : > { %v1601_v48 = vrot.slane %v1594_v45, %v2393_v46 }
 0x616   : > { %v1584_v49 = vrot.slane %v1577_v22, %v2396_v50 }
 0x617   : > { %v1602_v51 = vcombine.low %v1593_v23, %v1601_v48 }
 0x618   : > { %v1585_v53 = vcombine.high %v1584_v49, %v2196_v59  ;;  %v1614_v54 = vshrl.u32 %v1584_v49, 16 }
 0x619   : > { %v1609_v52 = vrot.slane %v1602_v51, %v2396_v50 }
 0x61a   : > { %v1620_v61 = vshrl.u32 %v1585_v53, 16 }
 0x61b   : > { %v1615_v55 = vshrl.u32 %v1609_v52, 16  ;;  %v1610_v56 = vcombine.high %v1609_v52, %v2196_v59  ;;  %v1613_v57 = vpack.i.b16 %v1609_v52, %v1584_v49 }
 0x61d   : > { %v1616_v58 = vpack.i.b16 %v1615_v55, %v1614_v54  ;;  %v1619_v60 = vpack.i.b16 %v1610_v56, %v1585_v53  ;;  %v1621_v62 = vshrl.u32 %v1610_v56, 16 }
 0x61f   : > { %1623 = vrot.lane.b32.xlu0 %v1616_v58, %s2197_s21  ;;  %1625 = vrot.lane.b32.xlu1 %v1619_v60, %s2198_s19  ;;  %v1622_v46 = vpack.i.b16 %v1621_v62, %v1620_v61  ;;  %s2568_s21 = scalar_lea.hbm %s2624_s8, %s1850_s12  ;;  %s2102_s19 = scalar_lea.vmem %s2570_s14, 128 }
 0x620   : > { %p2103_p8 = scmp.ne.s32.totalorder %s2570_s14, %s2102_s19 }
 0x622   : > { %p2104_p11 = pnand %p2103_p8, %p2636_p10 }
 0x623   : > { %1627 = vrot.lane.b32.xlu0 %v1622_v46, %s2199_s20  ;;  %s2200_s20 = smov [#allocation5]  }
 0x624   : > { %p2105_p13 = pneg %p2104_p11  ;;  %s2106_s24 = sshll.u32 %s2200_s20, 4  ;;  %s2107_s24 = int_to_ptr.vmem [resolvable:$false] %s2106_s24 }
 0x625   : > { %s2108_s25 = scalar_lea.vmem %s2107_s24, 256  ;;  %p2109_p1 = scmp.lt.s32.totalorder %s2570_s14, %s2107_s24 }
 0x626   : > { %p2110_p3 = scmp.lt.s32.totalorder %s2108_s25, %s2102_s19 }
 0x628   : > { %p2111_p5 = por %p2110_p3, %p2109_p1 }
 0x62a   : > { %p2112_p6 = pnand %p2111_p5, %p2105_p13 }
 0x691   : > { %v1624_v50 = vpop.permute.xlu0 %1623  ;;  %v1626_v0 = vpop.permute.xlu1 %1625 }
 0x692   : > { %v1631_v63 = vsel %vm1042_vm2, %v1613_v57, %v1624_v50 }
 0x693   : > { %v1633_v59 = vsel %vm334_vm0, %v1631_v63, %v1626_v0 }
 0x695   : > { %v1628_v1 = vpop.permute.xlu0 %1627 }
 0x696   : > { %v1636_v2 = vsel %vm1634_vm5, %v1633_v59, %v1628_v1 }
 0x697   : > { %1964 = vmatmul.mubr.msk.bf16.vlgmr.msra.gmra.mrb[20].mxu1 %vm1676_vm6, %v1636_v2 }
 0x76a   : > { %v1713_v3 = vpop.f32.mrb[20].mxu1 }
 0x76b   : > { %v1714_v4 = vadd.f32 %v1843_v9, %v1713_v3  ;;  %v1965_v5 = vpop.f32.mrb[21].mxu1 }
 0x76c   : > { %v1716_v6 = vpop.f32.mrb[22].mxu1 }
 0x76d   : > { %v1966_v7 = vpop.f32.mrb[23].mxu1  ;;  %1719 = vst.msk [vmem:[%s325_s26] sm:$0xff] %vm334_vm0, %v1714_v4 }
 0x76e   : > { %2115 = shalt.err (!%p2112_p6)
}
 0x76f   : > { %s2116_s22 = scalar_lea.hbm %s2568_s21, 128  ;;  %s2120_s26 = scalar_lea.hbm %s2624_s8, 256 }
 0x770   : > { %p2117_p7 = scmp.ne.s32.totalorder %s2568_s21, %s2116_s22  ;;  %p2121_p0 = scmp.lt.u32.totalorder %s2568_s21, %s2624_s8 }
 0x771   : > { %p2122_p2 = scmp.lt.u32.totalorder %s2120_s26, %s2116_s22  ;;  %p2124_p8 = scmp.lt.u32.totalorder %s2116_s22, %s2568_s21 }
 0x772   : > { %p2118_p9 = pnand %p2117_p7, %p2636_p10 }
 0x773   : > { %p2123_p4 = por %p2122_p2, %p2121_p0 }
 0x774   : > { %p2119_p12 = pneg %p2118_p9 }
 0x775   : > { %p2125_p11 = por %p2124_p8, %p2123_p4 }
 0x777   : > { %p2126_p13 = pnand %p2125_p11, %p2119_p12 }
 0x779   : > { %2129 = shalt.err (!%p2126_p13)
}
 0x77a   : > { %1971 = dma.vmem_to_hbm [thread:$0]  (%p2636_p10), %s2570_s14, 128, %s2568_s21, %s1721_s30  }
 0x77b PF: > { %p1983_p1 = scmp.ge.s32.totalorder %s2184_s10, 2  ;;  %s1747_s19 = sand.u32 1, %s2164_s27  }
 0x77c   : > { %p2637_p3 = scmp.ne.s32.totalorder %s2630_s17, 0  ;;  %s1748_s20 = scalar_lea.sflag [#allocation4], %s1747_s19 }
 0x77e   : > { %p1978_p5 = pnand %p1983_p1, %p2637_p3 }
 0x780   : > { %2159 = dma.done.wait (!%p1978_p5), %s1748_s20, 128  }
 0x781   : > { %2161 = vsyncadd (!%p1978_p5), %s1748_s20, 4294967168  ;;  %s22_s10 = sadd.s32 1, %s2184_s10   ;;  %s2638_s27 = smov %s2168_s28 }
 0x782   : > { %p19_p6 = scmp.ge.s32.totalorder %s22_s10, 4   ;;  %s2639_s28 = smov %s2172_s29 }
 0x783   : > { %s2640_s29 = smov %s2299_s18  ;;  %s2641_s30 = smov %s2180_s9 }
 0x784   : > { %s2642_s9 = smov %s2644_s13  ;;  %21 = sbr.rel (!%p19_p6) target bundleno = 5 (0x5), region = 92 }
 0x78b   :  { %1753 = vsyncpa [#allocation3], 1 }
 0x78c   :  { %1755 = vsyncpa [#allocation3 + $0x1], 1 }
 0x78d   :  { %1756 = vsyncpa [#allocation4], 1 }
 0x78e   :  { %1758 = vsyncpa [#allocation4 + $0x1], 1 }

</bundles_post_ra>
